<compile_context>
chip_gen: v7x
topology: tpu7x:2x2x1
jax: 0.10.0
libtpu: 0.0.40
codegen_flags: <defaults>
</compile_context>

<pallas_src>
import functools

import jax
import jax.numpy as jnp
from jax.experimental import pallas as pl
from jax.experimental.pallas import tpu as pltpu


def _softmax_body_kernel(x_ref, u_ref, action_ref, *, temperature, num_actions):
    # x_ref, u_ref: (A, TILE_B) -- actions on sublanes, batch on lanes.
    x = x_ref[...].astype(jnp.float32) * jnp.float32(temperature)

    # Gumbel-max categorical sampling: argmax_a(x + g), g = -log(-log(u)).
    u = jnp.maximum(u_ref[...], jnp.float32(1e-12))            # guard log(0)
    g = -jnp.log(-jnp.log(u))                                  # EUP transcendentals
    z = x + g                                                  # (A, TILE_B)

    # argmax over the 8-wide sublane (action) axis; smallest index wins ties.
    z_max = jnp.max(z, axis=0, keepdims=True)                  # (1, TILE_B)
    row_ids = jax.lax.broadcasted_iota(jnp.int32, z.shape, 0)  # (A, TILE_B)
    idx = jnp.min(jnp.where(z >= z_max, row_ids, num_actions),
                  axis=0, keepdims=True)                       # (1, TILE_B)

    # TODO(synk): torch multinomial returns int64 indices; we emit int32 (TPU-native).
    action_ref[...] = idx.astype(jnp.int32)


def softmax_body_forward(output, key, temperature, *, tile_b=32768):
    """output: (B, A) float logits; key: jax PRNG key; returns (B, 1) int32 actions."""
    B, A = output.shape

    # Transpose so the batch dim sits on lanes (lane-dense compute + output).
    x_t = jnp.asarray(output, jnp.float32).T                     # (A, B)
    u = jax.random.uniform(key, (A, B), dtype=jnp.float32)       # one uniform per (action, row)

    if B <= tile_b:
        tile_b = B                                               # single full block
        b_pad = B
    else:
        b_pad = pl.cdiv(B, tile_b) * tile_b                      # tile_b is a multiple of 128
        if b_pad != B:
            x_t = jnp.pad(x_t, ((0, 0), (0, b_pad - B)))
            u = jnp.pad(u, ((0, 0), (0, b_pad - B)), constant_values=0.5)

    grid = (b_pad // tile_b,)
    kernel = functools.partial(
        _softmax_body_kernel, temperature=float(temperature), num_actions=A)

    out = pl.pallas_call(
        kernel,
        out_shape=jax.ShapeDtypeStruct((1, b_pad), jnp.int32),
        grid=grid,
        in_specs=[
            pl.BlockSpec((A, tile_b), lambda i: (0, i)),
            pl.BlockSpec((A, tile_b), lambda i: (0, i)),
        ],
        out_specs=pl.BlockSpec((1, tile_b), lambda i: (0, i)),
        compiler_params=pltpu.CompilerParams(dimension_semantics=("parallel",)),
    )(x_t, u)

    return out[0, :B].reshape(B, 1)


if __name__ == "__main__":
    key = jax.random.PRNGKey(0)
    B, A = 2, 8                      # batch of brain outputs, 8 playable actions
    temperature = 7.0                # the agent's "certainty" (module multiplies by T)

    k_logits, k_sample = jax.random.split(key)
    logits = jax.random.normal(k_logits, (B, A), dtype=jnp.float32)

    actions = softmax_body_forward(logits, k_sample, temperature)
    actions = jax.block_until_ready(actions)

    assert actions.shape == (B, 1)
    assert actions.dtype == jnp.int32
    assert bool(jnp.all((actions >= 0) & (actions < A)))
    print("KERNEL_OK")
</pallas_src>

<mosaic_0001>
module attributes {stable_mosaic.version = 11 : i64} {
  func.func @_softmax_body_kernel(%arg0: i32, %arg1: memref<8x2xf32, #tpu.memory_space<vmem>>, %arg2: memref<8x2xf32, #tpu.memory_space<vmem>>, %arg3: memref<1x2xi32, #tpu.memory_space<vmem>>) attributes {dimension_semantics = [#tpu.dimension_semantics<parallel>], iteration_bounds = array<i64: 1>, scalar_prefetch = 0 : i64, scratch_operands = 0 : i64, tpu.core_type = #tpu.core_type<tc>, window_params = [{transform_indices = @transform_0, window_bounds = array<i64: 8, 2>}, {transform_indices = @transform_1, window_bounds = array<i64: 8, 2>}, {transform_indices = @transform_2, window_bounds = array<i64: 1, 2>}]} {
    %c0 = arith.constant 0 : index
    %c0_0 = arith.constant 0 : index
    %0 = vector.load %arg1[%c0, %c0_0] : memref<8x2xf32, #tpu.memory_space<vmem>>, vector<8x2xf32>
    %cst = arith.constant 7.000000e+00 : f32
    %1 = vector.broadcast %cst : f32 to vector<8x2xf32>
    %2 = arith.mulf %0, %1 : vector<8x2xf32>
    %c0_1 = arith.constant 0 : index
    %c0_2 = arith.constant 0 : index
    %3 = vector.load %arg2[%c0_1, %c0_2] : memref<8x2xf32, #tpu.memory_space<vmem>>, vector<8x2xf32>
    %cst_3 = arith.constant 9.99999996E-13 : f32
    %4 = vector.broadcast %cst_3 : f32 to vector<8x2xf32>
    %5 = arith.maximumf %3, %4 : vector<8x2xf32>
    %6 = math.log %5 : vector<8x2xf32>
    %cst_4 = arith.constant 0.000000e+00 : f32
    %7 = vector.broadcast %cst_4 : f32 to vector<8x2xf32>
    %8 = arith.subf %7, %6 : vector<8x2xf32>
    %9 = math.log %8 : vector<8x2xf32>
    %cst_5 = arith.constant 0.000000e+00 : f32
    %10 = vector.broadcast %cst_5 : f32 to vector<8x2xf32>
    %11 = arith.subf %10, %9 : vector<8x2xf32>
    %12 = arith.addf %2, %11 : vector<8x2xf32>
    %cst_6 = arith.constant dense<0xFF800000> : vector<2xf32>
    %13 = vector.multi_reduction <maximumf>, %12, %cst_6 [0] : vector<8x2xf32> to vector<2xf32>
    %14 = vector.shape_cast %13 : vector<2xf32> to vector<1x2xf32>
    %15 = tpu.iota {dimensions = array<i32: 0>} : vector<8x2xi32>
    %16 = vector.broadcast %14 : vector<1x2xf32> to vector<8x2xf32>
    %17 = arith.cmpf oge, %12, %16 : vector<8x2xf32>
    %c8_i32 = arith.constant 8 : i32
    %18 = vector.broadcast %c8_i32 : i32 to vector<8x2xi32>
    %19 = arith.select %17, %15, %18 : vector<8x2xi1>, vector<8x2xi32>
    %cst_7 = arith.constant dense<2147483647> : vector<2xi32>
    %20 = vector.multi_reduction <minsi>, %19, %cst_7 [0] : vector<8x2xi32> to vector<2xi32>
    %21 = vector.shape_cast %20 : vector<2xi32> to vector<1x2xi32>
    %c0_8 = arith.constant 0 : index
    %c0_9 = arith.constant 0 : index
    %22 = vector.load %arg3[%c0_8, %c0_9] : memref<1x2xi32, #tpu.memory_space<vmem>>, vector<1x2xi32>
    tpu.vector_store %arg3[%c0_8, %c0_9], %21 {strides = array<i32>} : memref<1x2xi32, #tpu.memory_space<vmem>>, vector<1x2xi32>,
    return
  }
  func.func @transform_0(%arg0: i32) -> (i32, i32) {
    %c0_i32 = arith.constant 0 : i32
    %c0_i32_0 = arith.constant 0 : i32
    return %c0_i32, %arg0 : i32, i32
  }
  func.func @transform_1(%arg0: i32) -> (i32, i32) {
    %c0_i32 = arith.constant 0 : i32
    %c0_i32_0 = arith.constant 0 : i32
    return %c0_i32, %arg0 : i32, i32
  }
  func.func @transform_2(%arg0: i32) -> (i32, i32) {
    %c0_i32 = arith.constant 0 : i32
    %c0_i32_0 = arith.constant 0 : i32
    return %c0_i32, %arg0 : i32, i32
  }
}

</mosaic_0001>

<bundles_post_ra>
// kernel: tpu_custom_call.1
= control target key start
LH: loop header
LB: loop body
LE: loop exit
PB: predicated region body
PF: predicated region fallthrough
CT: control target
= control target key end

     0   :  { %s124_s0 = inlined_call_operand.vmem [shape: f32[8,2], index: 0, kind: input, shape index: {}]   ;;  %s125_s1 = inlined_call_operand.vmem [shape: f32[8,2], index: 1, kind: input, shape index: {}]   ;;  %s126_s2 = inlined_call_operand.hbm [shape: s32[1,2], index: 2, kind: output, shape index: {}]  }
   0x1   :  { %v14_v0 = vld [vmem:[%s125_s1] sm:$0xff] }
   0x2   :  { %7 = vsyncpa [#allocation3], 0  ;;  %v15_v1 = vmax.f32 %v14_v0, 1e-12  ;;  %v12_v5 = vld [vmem:[%s124_s0] sm:$0xff]  ;;  %vm23_vm0 = vcmask 15360   ;;  %v31_v15 = vlaneseq }
   0x3   :  { %v13_v7 = vmul.f32 7.0, %v12_v5  ;;  %s90_s0 = smov [#allocation2]   ;;  %vm45_vm4 = vcmask 8192  }
   0x4   :  { %62 = vlog2.f32 %v15_v1  ;;  %v32_v18 = vshrl.u32 %v31_v15, 7  ;;  %s53_s1 = sshll.u32 %s90_s0, 4  ;;  %s54_s1 = int_to_ptr.vmem [resolvable:$true] %s53_s1 }
   0x5   :  { %s66_s13 = scalar_lea.vmem %s54_s1, 16  ;;  %s70_s14 = scalar_lea.vmem %s54_s1, 32 }
   0x6   :  { %p67_p0 = scmp.ne.s32.totalorder %s54_s1, %s66_s13  ;;  %p71_p1 = scmp.lt.s32.totalorder %s54_s1, %s54_s1 }
   0x7   :  { %p72_p2 = scmp.lt.s32.totalorder %s70_s14, %s66_s13 }
   0x9   :  { %p73_p3 = por %p72_p2, %p71_p1 }
   0xb   :  { %p74_p4 = pnand %p73_p3, %p67_p0 }
   0xe   :  { %v63_v2 = vpop.eup %62 }
   0xf   :  { %v17_v3 = vmul.f32 0.6931472, %v63_v2 }
  0x11   :  { %v18_v4 = vsub.f32 0.0, %v17_v3 }
  0x13   :  { %64 = vlog2.f32 %v18_v4 }
  0x1d   :  { %v65_v6 = vpop.eup %64 }
  0x1e   :  { %v20_v8 = vmul.f32 0.6931472, %v65_v6 }
  0x20   :  { %v21_v9 = vsub.f32 0.0, %v20_v8 }
  0x22   :  { %v22_v10 = vadd.f32 %v21_v9, %v13_v7 }
  0x24   :  { %v24_v11 = vsel %vm23_vm0, %v22_v10, -inf }
  0x25   :  { %v25_v12 = vrot.slane %v24_v11, 4 }
  0x27   :  { %v26_v13 = vmax.f32 %v24_v11, %v25_v12 }
  0x29   :  { %v27_v14 = vrot.slane %v26_v13, 2 }
  0x2b   :  { %v28_v16 = vmax.f32 %v26_v13, %v27_v14 }
  0x2d   :  { %v29_v17 = vrot.slane %v28_v16, 1 }
  0x2f   :  { %v30_v19 = vmax.f32 %v28_v16, %v29_v17 }
  0x31   :  { %vm33_vm1 = vcmp.ge.f32.partialorder %v22_v10, %v30_v19 }
  0x32   :  { %v34_v20 = vsel %vm33_vm1, %v32_v18, 8 }
  0x33   :  { %v35_v21 = vsel %vm23_vm0, %v34_v20, 2147483647 }
  0x34   :  { %v36_v22 = vrot.slane %v35_v21, 4 }
  0x36   :  { %vm37_vm2 = vcmp.lt.s32.totalorder %v35_v21, %v36_v22 }
  0x37   :  { %v38_v23 = vsel %vm37_vm2, %v35_v21, %v36_v22 }
  0x38   :  { %v39_v24 = vrot.slane %v38_v23, 2 }
  0x3a   :  { %vm40_vm3 = vcmp.lt.s32.totalorder %v38_v23, %v39_v24 }
  0x3b   :  { %v41_v25 = vsel %vm40_vm3, %v38_v23, %v39_v24 }
  0x3c   :  { %v42_v26 = vrot.slane %v41_v25, 1 }
  0x3e   :  { %vm43_vm5 = vcmp.lt.s32.totalorder %v41_v25, %v42_v26 }
  0x3f   :  { %v44_v27 = vsel %vm43_vm5, %v41_v25, %v42_v26 }
  0x40   :  { %46 = vst.msk [vmem:[#allocation2] sm:$0x1] %vm45_vm4, %v44_v27 }
  0x41   :  { %77 = shalt.err (!%p74_p4)
}
  0x42   :  { %s78_s17 = scalar_lea.hbm %s126_s2, 16 }
  0x43   :  { %p79_p5 = scmp.ne.s32.totalorder %s126_s2, %s78_s17  ;;  %p82_p6 = scmp.lt.u32.totalorder %s78_s17, %s126_s2 }
  0x45   :  { %p84_p7 = pnand %p82_p6, %p79_p5 }
  0x47   :  { %87 = shalt.err (!%p84_p7)
}
  0x48   :  { %56 = dma.vmem_to_hbm [thread:$0]  %s54_s1, 16, %s126_s2, [#allocation3]  }
  0x49   :  { %88 = dma.done.wait [#allocation3], 16  }
  0x4a   :  { %89 = vsyncadd [#allocation3], 4294967280 }
  0x4b   :  { %60 = vsyncpa [#allocation3], 1 }

</bundles_post_ra>
